<compile_context>
chip_gen: v7x
topology: tpu7x:2x2x1
jax: 0.10.0
libtpu: 0.0.40
codegen_flags: <defaults>
</compile_context>

<pallas_src>
import jax
import jax.numpy as jnp
from jax.experimental import pallas as pl
from jax.experimental.pallas import tpu as pltpu


# ----------------------------- Pallas kernel --------------------------------

def _conv_bn_relu_kernel(x_ref, w_ref, b_ref, o_ref):
    # x_ref: (H, W, Cin)       bf16  un-padded NHWC tile of one image
    # w_ref: (3, 3*Cin, co_t)  bf16  BN-folded weights, K = (dx, ci) folded
    # b_ref: (1, co_t)         f32   BN-folded bias
    # o_ref: (H*W, co_t)       bf16  output tile, same layout as the accumulator
    H, W, Cin = x_ref.shape
    K = w_ref.shape[1]                 # 3 * Cin
    co_t = w_ref.shape[2]

    x = x_ref[...]                     # single VMEM load of the tile

    # Build the dx-folded activation ONCE per grid step (reused by all 3 dy):
    #   xcat[h, w, dx*Cin + ci] = x[h, w + dx - 1, ci]  (zero outside W)
    zc = jnp.zeros((H, 1, Cin), x.dtype)
    x_l = jnp.concatenate([zc, x[:, :W - 1, :]], axis=1)       # tap dx = 0
    x_r = jnp.concatenate([x[:, 1:, :], zc], axis=1)           # tap dx = 2
    xcat = jnp.concatenate([x_l, x, x_r], axis=-1)             # (H, W, 3*Cin)
    # dy halo: one zero row top and bottom (in-kernel, no external jnp.pad).
    zr = jnp.zeros((1, W, K), x.dtype)
    xpad = jnp.concatenate([zr, xcat, zr], axis=0)             # (H+2, W, 3*Cin)
    xflat = xpad.reshape((H + 2) * W, K)

    # 3 accumulated MXU matmuls, K = 3*Cin (statically unrolled).
    acc = jnp.zeros((H * W, co_t), jnp.float32)
    for dy in range(3):
        acc = acc + jnp.dot(xflat[dy * W: dy * W + H * W, :], w_ref[dy],
                            preferred_element_type=jnp.float32)

    # Folded BN bias + ReLU, dense bf16 store matching the accumulator layout.
    o_ref[...] = jnp.maximum(acc + b_ref[...], 0.0).astype(o_ref.dtype)


# ----------------------------- wrapper ---------------------------------------

def _default_vmem_limit_bytes():
    cap = 128 * 1024 * 1024
    try:
        info = pltpu.get_tpu_info()
        cap = getattr(info, "vmem_capacity_bytes", cap) or cap
    except Exception:
        pass
    # ~75% of physical (=> ~48 MiB on v7x), capped at 100 MiB on v5e/v6e.
    return int(min(cap * 3 // 4, 100 * 1024 * 1024))


def conv_bn_relu_nhwc(x_nhwc, w9, conv_bias, gamma, beta, running_mean,
                      running_var, eps=1e-5):
    """relu(BN(conv3x3(x))) on NHWC input, BN folded into the conv (inference)."""
    N, H, W, Cin = x_nhwc.shape
    Cout = w9.shape[-1]
    assert w9.shape == (9, Cin, Cout)

    # --- fold BatchNorm into weight / bias ---
    scale = gamma / jnp.sqrt(running_var + eps)                   # (Cout,)
    w_f = w9 * scale                                              # (9, Cin, Cout)
    b_f = beta + (conv_bias - running_mean) * scale               # (Cout,)

    # --- pad Cout to a multiple of 128: dense-lane stores, no masked vst ---
    co_t = 128
    Cp = ((Cout + co_t - 1) // co_t) * co_t
    if Cp != Cout:
        w_f = jnp.pad(w_f, ((0, 0), (0, 0), (0, Cp - Cout)))
        b_f = jnp.pad(b_f, ((0, Cp - Cout),))
    co_tiles = Cp // co_t

    # --- fold the dx taps into K: (9, Cin, Cp) -> (3, 3*Cin, Cp) ---
    # TODO(synk): for 128-aligned-K MXU feeds at tiny Cin, Cin could be
    # zero-padded per dx slot; skipped to avoid inflating MXU work.
    w_k = w_f.reshape(3, 3 * Cin, Cp).astype(jnp.bfloat16)
    b_k = b_f.reshape(1, Cp).astype(jnp.float32)

    x = x_nhwc.astype(jnp.bfloat16)

    # --- grid order: keep whichever operand is larger resident in VMEM ---
    w_bytes = w_k.size * 2
    act_bytes_img = H * W * Cin * 2
    weight_resident = (N - 1) * w_bytes > (co_tiles - 1) * act_bytes_img

    if weight_resident:
        grid = (co_tiles, N)          # inner axis = N: weight tile DMA'd once
        x_map = lambda j, n: (n, 0, 0, 0)
        w_map = lambda j, n: (0, 0, j)
        b_map = lambda j, n: (0, j)
        o_map = lambda j, n: (n, 0, j)
    else:
        grid = (N, co_tiles)          # inner axis = Cout tiles: activation resident
        x_map = lambda n, j: (n, 0, 0, 0)
        w_map = lambda n, j: (0, 0, j)
        b_map = lambda n, j: (0, j)
        o_map = lambda n, j: (n, 0, j)

    out_shape = jax.ShapeDtypeStruct((N, H * W, Cp), jnp.bfloat16)

    flops = 2 * N * H * W * 3 * (3 * Cin) * Cp
    bytes_accessed = (N * act_bytes_img * (co_tiles if weight_resident else 1)
                      + w_bytes * (1 if weight_resident else N)
                      + b_k.size * 4
                      + N * H * W * Cp * 2)                       # bf16 output

    out = pl.pallas_call(
        _conv_bn_relu_kernel,
        out_shape=out_shape,
        grid=grid,
        in_specs=[
            pl.BlockSpec((None, H, W, Cin), x_map),
            pl.BlockSpec((3, 3 * Cin, co_t), w_map),
            pl.BlockSpec((1, co_t), b_map),
        ],
        out_specs=pl.BlockSpec((None, H * W, co_t), o_map),
        compiler_params=pltpu.CompilerParams(
            dimension_semantics=("parallel", "parallel"),
            vmem_limit_bytes=_default_vmem_limit_bytes()),
        cost_estimate=pl.CostEstimate(flops=flops, transcendentals=0,
                                      bytes_accessed=bytes_accessed),
    )(x, w_k, b_k)

    if Cp != Cout:
        out = out[:, :, :Cout]                      # drop padded channels
    return out.reshape(N, H, W, Cout)               # NHWC


def conv_bn_relu(x_nchw, w9, conv_bias, gamma, beta, running_mean, running_var,
                 eps=1e-5):
    """PyTorch-layout entry point (NCHW in / NCHW out). Keep NHWC between
    layers in a real network to drop these transposes."""
    x_nhwc = jnp.transpose(x_nchw, (0, 2, 3, 1))
    y = conv_bn_relu_nhwc(x_nhwc, w9, conv_bias, gamma, beta,
                          running_mean, running_var, eps=eps)
    return jnp.transpose(y, (0, 3, 1, 2))


# ----------------------------- demo / check ----------------------------------

if __name__ == "__main__":
    key = jax.random.PRNGKey(0)
    N, Cin, H, W = 2, 4, 16, 16
    Cout = 32
    eps = 1e-5

    k = jax.random.split(key, 7)
    x = jax.random.normal(k[0], (N, Cin, H, W), jnp.float32)        # NCHW (PyTorch)
    fan_in = 9 * Cin                                                 # kaiming_normal_
    w9 = jax.random.normal(k[1], (9, Cin, Cout), jnp.float32) * jnp.sqrt(2.0 / fan_in)
    conv_b = 0.1 * jax.random.normal(k[2], (Cout,), jnp.float32)
    gamma = 1.0 + 0.1 * jax.random.normal(k[3], (Cout,), jnp.float32)
    beta = 0.1 * jax.random.normal(k[4], (Cout,), jnp.float32)
    run_mean = 0.05 * jax.random.normal(k[5], (Cout,), jnp.float32)
    run_var = jax.random.uniform(k[6], (Cout,), jnp.float32, 0.5, 1.5)

    out = conv_bn_relu(x, w9, conv_b, gamma, beta, run_mean, run_var, eps=eps)
    out = jax.block_until_ready(out)
    assert out.shape == (N, Cout, H, W), out.shape

    # Pure-JAX reference: same BN fold, same bf16 rounding of operands, f32 math.
    scale = gamma / jnp.sqrt(run_var + eps)
    w_ref = (w9 * scale).reshape(3, 3, Cin, Cout).astype(jnp.bfloat16).astype(jnp.float32)
    b_ref = beta + (conv_b - run_mean) * scale
    x_nhwc = jnp.transpose(x, (0, 2, 3, 1)).astype(jnp.bfloat16).astype(jnp.float32)
    ref = jax.lax.conv_general_dilated(
        x_nhwc, w_ref,
        window_strides=(1, 1), padding=((1, 1), (1, 1)),
        dimension_numbers=("NHWC", "HWIO", "NHWC"),
        precision=jax.lax.Precision.HIGHEST,
        preferred_element_type=jnp.float32)
    ref = jnp.maximum(ref + b_ref, 0.0)
    ref = jnp.transpose(ref, (0, 3, 1, 2))

    # Kernel output is bf16 -> compare with a bf16-appropriate tolerance.
    err = float(jnp.max(jnp.abs(out.astype(jnp.float32) - ref)))
    assert err < 6e-2, f"max abs error {err}"
    print("KERNEL_OK")
</pallas_src>

<mosaic_0001>
module attributes {stable_mosaic.version = 11 : i64} {
  func.func @_conv_bn_relu_kernel(%arg0: i32, %arg1: i32, %arg2: memref<1x16x16x4xbf16, #tpu.memory_space<vmem>>, %arg3: memref<3x12x128xbf16, #tpu.memory_space<vmem>>, %arg4: memref<1x128xf32, #tpu.memory_space<vmem>>, %arg5: memref<1x256x128xbf16, #tpu.memory_space<vmem>>) attributes {dimension_semantics = [#tpu.dimension_semantics<parallel>, #tpu.dimension_semantics<parallel>], iteration_bounds = array<i64: 1, 2>, scalar_prefetch = 0 : i64, scratch_operands = 0 : i64, tpu.core_type = #tpu.core_type<tc>, window_params = [{transform_indices = @transform_0, window_bounds = array<i64: 1, 16, 16, 4>}, {transform_indices = @transform_1, window_bounds = array<i64: 3, 12, 128>}, {transform_indices = @transform_2, window_bounds = array<i64: 1, 128>}, {transform_indices = @transform_3, window_bounds = array<i64: 1, 256, 128>}]} {
    %c0 = arith.constant 0 : index
    %c0_0 = arith.constant 0 : index
    %c0_1 = arith.constant 0 : index
    %c0_2 = arith.constant 0 : index
    %0 = vector.load %arg2[%c0, %c0_0, %c0_1, %c0_2] : memref<1x16x16x4xbf16, #tpu.memory_space<vmem>>, vector<1x16x16x4xbf16>
    %1 = vector.shape_cast %0 : vector<1x16x16x4xbf16> to vector<16x16x4xbf16>
    %cst = arith.constant 0.000000e+00 : bf16
    %2 = vector.broadcast %cst : bf16 to vector<16x1x4xbf16>
    %3 = vector.extract_strided_slice %1 {offsets = [0, 0, 0], sizes = [16, 15, 4], strides = [1, 1, 1]} : vector<16x16x4xbf16> to vector<16x15x4xbf16>
    %4 = tpu.concatenate %2, %3 in 1 : vector<16x1x4xbf16>, vector<16x15x4xbf16> -> vector<16x16x4xbf16>
    %5 = vector.extract_strided_slice %1 {offsets = [0, 1, 0], sizes = [16, 15, 4], strides = [1, 1, 1]} : vector<16x16x4xbf16> to vector<16x15x4xbf16>
    %6 = tpu.concatenate %5, %2 in 1 : vector<16x15x4xbf16>, vector<16x1x4xbf16> -> vector<16x16x4xbf16>
    %7 = tpu.concatenate %4, %1, %6 in 2 : vector<16x16x4xbf16>, vector<16x16x4xbf16>, vector<16x16x4xbf16> -> vector<16x16x12xbf16>
    %cst_3 = arith.constant 0.000000e+00 : bf16
    %8 = vector.broadcast %cst_3 : bf16 to vector<1x16x12xbf16>
    %9 = tpu.concatenate %8, %7, %8 in 0 : vector<1x16x12xbf16>, vector<16x16x12xbf16>, vector<1x16x12xbf16> -> vector<18x16x12xbf16>
    %10 = vector.shape_cast %9 : vector<18x16x12xbf16> to vector<288x12xbf16>
    %cst_4 = arith.constant 0.000000e+00 : f32
    %11 = vector.broadcast %cst_4 : f32 to vector<256x128xf32>
    %12 = vector.extract_strided_slice %10 {offsets = [0, 0], sizes = [256, 12], strides = [1, 1]} : vector<288x12xbf16> to vector<256x12xbf16>
    %c0_5 = arith.constant 0 : index
    %c0_6 = arith.constant 0 : index
    %c0_7 = arith.constant 0 : index
    %13 = vector.load %arg3[%c0_5, %c0_6, %c0_7] : memref<3x12x128xbf16, #tpu.memory_space<vmem>>, vector<1x12x128xbf16>
    %14 = vector.shape_cast %13 : vector<1x12x128xbf16> to vector<12x128xbf16>
    %cst_8 = arith.constant dense<0.000000e+00> : vector<256x128xf32>
    %15 = tpu.matmul %12, %14, %cst_8 {dimension_numbers = #tpu.dot_dimension_numbers<[1], [0], [0], [1], [0, 0, 1, 1], [], []>} : vector<256x12xbf16>, vector<12x128xbf16>, vector<256x128xf32> -> vector<256x128xf32>
    %16 = arith.addf %11, %15 : vector<256x128xf32>
    %17 = vector.extract_strided_slice %10 {offsets = [16, 0], sizes = [256, 12], strides = [1, 1]} : vector<288x12xbf16> to vector<256x12xbf16>
    %c1 = arith.constant 1 : index
    %c0_9 = arith.constant 0 : index
    %c0_10 = arith.constant 0 : index
    %18 = vector.load %arg3[%c1, %c0_9, %c0_10] : memref<3x12x128xbf16, #tpu.memory_space<vmem>>, vector<1x12x128xbf16>
    %19 = vector.shape_cast %18 : vector<1x12x128xbf16> to vector<12x128xbf16>
    %cst_11 = arith.constant dense<0.000000e+00> : vector<256x128xf32>
    %20 = tpu.matmul %17, %19, %cst_11 {dimension_numbers = #tpu.dot_dimension_numbers<[1], [0], [0], [1], [0, 0, 1, 1], [], []>} : vector<256x12xbf16>, vector<12x128xbf16>, vector<256x128xf32> -> vector<256x128xf32>
    %21 = arith.addf %16, %20 : vector<256x128xf32>
    %22 = vector.extract_strided_slice %10 {offsets = [32, 0], sizes = [256, 12], strides = [1, 1]} : vector<288x12xbf16> to vector<256x12xbf16>
    %c2 = arith.constant 2 : index
    %c0_12 = arith.constant 0 : index
    %c0_13 = arith.constant 0 : index
    %23 = vector.load %arg3[%c2, %c0_12, %c0_13] : memref<3x12x128xbf16, #tpu.memory_space<vmem>>, vector<1x12x128xbf16>
    %24 = vector.shape_cast %23 : vector<1x12x128xbf16> to vector<12x128xbf16>
    %cst_14 = arith.constant dense<0.000000e+00> : vector<256x128xf32>
    %25 = tpu.matmul %22, %24, %cst_14 {dimension_numbers = #tpu.dot_dimension_numbers<[1], [0], [0], [1], [0, 0, 1, 1], [], []>} : vector<256x12xbf16>, vector<12x128xbf16>, vector<256x128xf32> -> vector<256x128xf32>
    %26 = arith.addf %21, %25 : vector<256x128xf32>
    %c0_15 = arith.constant 0 : index
    %c0_16 = arith.constant 0 : index
    %27 = vector.load %arg4[%c0_15, %c0_16] : memref<1x128xf32, #tpu.memory_space<vmem>>, vector<1x128xf32>
    %28 = vector.broadcast %27 : vector<1x128xf32> to vector<256x128xf32>
    %29 = arith.addf %26, %28 : vector<256x128xf32>
    %cst_17 = arith.constant 0.000000e+00 : f32
    %30 = vector.broadcast %cst_17 : f32 to vector<256x128xf32>
    %31 = arith.maximumf %29, %30 : vector<256x128xf32>
    %32 = arith.truncf %31 : vector<256x128xf32> to vector<256x128xbf16>
    %c0_18 = arith.constant 0 : index
    %c0_19 = arith.constant 0 : index
    %c0_20 = arith.constant 0 : index
    %33 = vector.load %arg5[%c0_18, %c0_19, %c0_20] : memref<1x256x128xbf16, #tpu.memory_space<vmem>>, vector<1x256x128xbf16>
    %34 = vector.shape_cast %33 : vector<1x256x128xbf16> to vector<256x128xbf16>
    %35 = vector.shape_cast %32 : vector<256x128xbf16> to vector<1x256x128xbf16>
    tpu.vector_store %arg5[%c0_18, %c0_19, %c0_20], %35 {strides = array<i32>} : memref<1x256x128xbf16, #tpu.memory_space<vmem>>, vector<1x256x128xbf16>,
    return
  }
  func.func @transform_0(%arg0: i32, %arg1: i32) -> (i32, i32, i32, i32) {
    %c0_i32 = arith.constant 0 : i32
    %c0_i32_0 = arith.constant 0 : i32
    %c0_i32_1 = arith.constant 0 : i32
    %c0_i32_2 = arith.constant 0 : i32
    return %arg1, %c0_i32, %c0_i32_0, %c0_i32_1 : i32, i32, i32, i32
  }
  func.func @transform_1(%arg0: i32, %arg1: i32) -> (i32, i32, i32) {
    %c0_i32 = arith.constant 0 : i32
    %c0_i32_0 = arith.constant 0 : i32
    %c0_i32_1 = arith.constant 0 : i32
    return %c0_i32, %c0_i32_0, %arg0 : i32, i32, i32
  }
  func.func @transform_2(%arg0: i32, %arg1: i32) -> (i32, i32) {
    %c0_i32 = arith.constant 0 : i32
    %c0_i32_0 = arith.constant 0 : i32
    return %c0_i32, %arg0 : i32, i32
  }
  func.func @transform_3(%arg0: i32, %arg1: i32) -> (i32, i32, i32) {
    %c0_i32 = arith.constant 0 : i32
    %c0_i32_0 = arith.constant 0 : i32
    return %arg1, %c0_i32, %arg0 : i32, i32, i32
  }
}

</mosaic_0001>

<bundles_post_ra>
// kernel: tpu_custom_call.1
= control target key start
LH: loop header
LB: loop body
LE: loop exit
PB: predicated region body
PF: predicated region fallthrough
CT: control target
= control target key end

     0   :  { %8 = vsyncpa [#allocation3], 0  ;;  %s3066_s0 = inlined_call_operand.hbm [shape: bf16[2,16,16,4], index: 0, kind: input, shape index: {}]   ;;  %s3067_s1 = inlined_call_operand.hbm [shape: bf16[3,12,128], index: 1, kind: input, shape index: {}]   ;;  %s3068_s2 = inlined_call_operand.hbm [shape: f32[1,128], index: 2, kind: input, shape index: {}]   ;;  %s3069_s3 = inlined_call_operand.hbm [shape: bf16[2,256,128], index: 3, kind: output, shape index: {}]  }
   0x1   :  { %10 = vsyncpa [#allocation3 + $0x1], 0 }
   0x2   :  { %11 = vsyncpa [#allocation6], 0 }
   0x3   :  { %12 = vsyncpa [#allocation4], 0 }
   0x4   :  { %14 = vsyncpa [#allocation4 + $0x1], 0  ;;  %s2450_s12 = smov 0   ;;  %s2452_s13 = smov 0  }
   0x5   :  { %s2454_s14 = smov 0   ;;  %s2456_s15 = smov 0  }
   0x6   :  { %s2458_s16 = smov 0   ;;  %s2460_s17 = smov 0  }
   0x7 LB: > { %s1669_s18 = sadd.s32 4294967295, %s2418_s17   ;;  %s1670_s19 = sadd.s32 4294967294, %s2418_s17   ;;  %s2418_s17 = sphi %s2460_s17, %s20_s17   ;;  %s2414_s16 = sphi %s2458_s16, %s3095_s16   ;;  %s2410_s15 = sphi %s2456_s15, %s3094_s15   ;;  %s2406_s14 = sphi %s2454_s14, %s3093_s14   ;;  %s2402_s13 = sphi %s2452_s13, %s3092_s13   ;;  %s2398_s12 = sphi %s2450_s12, %s3091_s12  }
   0x8   : > { %p52_p0 = scmp.ne.s32.totalorder %s2402_s13, %s2398_s12  ;;  %p2484_p1 = scmp.eq.s32.totalorder %s1669_s18, 0 }
   0x9   : > { %p2488_p2 = scmp.eq.s32.totalorder %s1669_s18, 1  ;;  %p136_p3 = scmp.eq.s32.totalorder %s1670_s19, 1 }
   0xa   : > { %s3074_s20 = scalar_select %p2484_p1, 1, 0 }
   0xb   : > { %p2494_p4 = por %p2484_p1, %p52_p0  ;;  %p1671_p5 = scmp.ge.s32.totalorder %s2418_s17, 1 }
   0xc   : > { %p2499_p6 = por %p136_p3, %p52_p0  ;;  %p143_p7 = scmp.lt.s32.totalorder %s2418_s17, 3 }
   0xd   : > { %s3076_s22 = scalar_select %p2494_p4, 1, 0 }
   0xe   : > { %s3077_s23 = scalar_select %p2499_p6, 1, 0 }
   0xf   : > { %p2504_p8 = pnand %p1671_p5, %p143_p7  ;;  %s2420_s25 = smov [#allocation5]  }
  0x10   : > { %s157_s26 = sshll.u32 %s2420_s25, 4  ;;  %s2421_s28 = smov [#allocation7]   ;;  %s2508_s26 = int_to_ptr.vmem [resolvable:$true] %s157_s26 }
  0x11   : > { %p2150_p9 = pneg %p2504_p8  ;;  %s173_s29 = sshll.u32 %s2421_s28, 4  ;;  %s2519_s29 = int_to_ptr.vmem [resolvable:$true] %s173_s29 }
  0x12   : > { %s2246_s5 = scalar_lea.hbm %s3067_s1, 384 }
  0x13   : > { %p2515_p11 = pnand %p2150_p9, %p2484_p1  ;;  %p2247_p12 = scmp.ne.s32.totalorder %s3067_s1, %s2246_s5 }
  0x14   : > { %p2253_p5 = scmp.lt.u32.totalorder %s2246_s5, %s3067_s1 }
  0x15   : > { %p2248_p13 = pneg %p2515_p11 }
  0x17   : > { %p2249_p0 = pnand %p2248_p13, %p2247_p12 }
  0x19   : > { %p2250_p3 = pneg %p2249_p0 }
  0x1b   : > { %p2255_p7 = pnand %p2253_p5, %p2250_p3 }
  0x1d   : > { %2258 = shalt.err (!%p2255_p7)
}
  0x1e   : > { %s2259_s10 = scalar_lea.vmem %s2508_s26, 384  ;;  %p2267_p1 = scmp.lt.s32.totalorder %s2508_s26, %s2508_s26 }
  0x1f   : > { %p2260_p9 = scmp.ne.s32.totalorder %s2508_s26, %s2259_s10  ;;  %p2268_p12 = scmp.lt.s32.totalorder %s2259_s10, %s2259_s10 }
  0x21   : > { %p2262_p10 = pnand %p2260_p9, %p2248_p13  ;;  %p2269_p0 = por %p2268_p12, %p2267_p1 }
  0x23   : > { %p2263_p6 = pneg %p2262_p10 }
  0x25   : > { %p2270_p4 = pnand %p2269_p0, %p2263_p6 }
  0x27   : > { %2273 = shalt.err (!%p2270_p4)
}
  0x28   : > { %s2422_s11 = smov 64   ;;  %s2423_s18 = smov 4  }
  0x29   : > { %2153 = dma.hbm_to_vmem [thread:$0]  (!%p2515_p11), %s3067_s1, 384, %s2508_s26, [#allocation6], %s2422_s11, %s2422_s11, %s2423_s18  }
  0x2a   : > { %s2274_s4 = scalar_lea.hbm %s3068_s2, 16 }
  0x2b   : > { %p2275_p1 = scmp.ne.s32.totalorder %s3068_s2, %s2274_s4  ;;  %p2281_p10 = scmp.lt.u32.totalorder %s2274_s4, %s3068_s2 }
  0x2d   : > { %p2277_p4 = pnand %p2275_p1, %p2248_p13 }
  0x2f   : > { %p2278_p6 = pneg %p2277_p4 }
  0x31   : > { %p2283_p3 = pnand %p2281_p10, %p2278_p6 }
  0x33   : > { %2286 = shalt.err (!%p2283_p3)
}
  0x34   : > { %s2287_s26 = scalar_lea.vmem %s2519_s29, 16  ;;  %s2294_s9 = scalar_lea.vmem %s2519_s29, 32 }
  0x35   : > { %p2288_p5 = scmp.ne.s32.totalorder %s2519_s29, %s2287_s26  ;;  %p2295_p12 = scmp.lt.s32.totalorder %s2519_s29, %s2519_s29 }
  0x36   : > { %p2296_p0 = scmp.lt.s32.totalorder %s2294_s9, %s2287_s26 }
  0x37   : > { %p2290_p7 = pnand %p2288_p5, %p2248_p13 }
  0x38   : > { %p2297_p1 = por %p2296_p0, %p2295_p12 }
  0x39   : > { %p2291_p9 = pneg %p2290_p7 }
  0x3b   : > { %p2298_p4 = pnand %p2297_p1, %p2291_p9 }
  0x3d   : > { %2301 = shalt.err (!%p2298_p4)
}
  0x3e   : > { %2156 = dma.hbm_to_vmem [thread:$0]  (!%p2515_p11), %s3068_s2, 16, %s2519_s29, [#allocation6]  }
  0x3f   : > { %s29_s25 = sadd.s32 1, %s2414_s16  ;;  %s39_s28 = sadd.s32 1, %s2406_s14 }
  0x40   : > { %p30_p13 = scmp.ge.s32.totalorder %s29_s25, 2  ;;  %p46_p6 = scmp.ne.s32.totalorder %s2406_s14, %s2402_s13 }
  0x41   : > { %p47_p10 = scmp.eq.s32.totalorder %s2418_s17, 0  ;;  %p2167_p3 = scmp.lt.s32.totalorder %s2418_s17, 2 }
  0x42   : > { %s3097_s25 = smov (%p30_p13, %s29_s25), 0  ;;  %p2587_p7 = por %p2488_p2, %p46_p6 }
  0x43   : > { %p48_p5 = por %p47_p10, %p46_p6  ;;  %s36_s30 = ssub.s32 %s2414_s16, %s3097_s25 }
  0x44   : > { %s3080_s27 = scalar_select %p2587_p7, 1, 0 }
  0x45   : > { %s184_s4 = sand.u32 1, %s2406_s14   ;;  %p37_p9 = scmp.eq.s32.totalorder %s36_s30, 0 }
  0x46   : > { %s1675_s29 = sshll.u32 %s184_s4, 7  ;;  %s1786_s5 = sshll.u32 %s2414_s16, 11 }
  0x47   : > { %s2596_s6 = scalar_select %p37_p9, %s2406_s14, %s39_s28  }
  0x48   : > { %s2601_s26 = scalar_lea.hbm %s3066_s0, %s1786_s5  ;;  %s188_s21 = scalar_lea.vmem [#allocation2], %s1675_s29 }
  0x49   : > { %s195_s9 = sshll.u32 %s188_s21, 4  ;;  %p2605_p2 = pnand %p2167_p3, %p48_p5  ;;  %s2609_s9 = int_to_ptr.vmem [resolvable:$true] %s195_s9 }
  0x4a   : > { %s2611_s19 = scalar_lea.sflag [#allocation3], %s184_s4  ;;  %s2302_s28 = scalar_lea.hbm %s2601_s26, 2048 }
  0x4b   : > { %p2303_p11 = scmp.ne.s32.totalorder %s2601_s26, %s2302_s28  ;;  %p2304_p12 = pneg %p2605_p2 }
  0x4c   : > { %s2307_s5 = scalar_lea.hbm %s3066_s0, 4096  ;;  %p2308_p4 = scmp.lt.u32.totalorder %s2601_s26, %s3066_s0 }
  0x4d   : > { %p2305_p0 = pnand %p2304_p12, %p2303_p11  ;;  %p2309_p13 = scmp.lt.u32.totalorder %s2307_s5, %s2302_s28 }
  0x4e   : > { %p2311_p10 = scmp.lt.u32.totalorder %s2302_s28, %s2601_s26 }
  0x4f   : > { %p2306_p1 = pneg %p2305_p0  ;;  %p2310_p6 = por %p2309_p13, %p2308_p4 }
  0x51   : > { %p2312_p3 = por %p2311_p10, %p2310_p6 }
  0x53   : > { %p2313_p5 = pnand %p2312_p3, %p2306_p1 }
  0x55   : > { %2316 = shalt.err (!%p2313_p5)
}
  0x56   : > { %s2317_s4 = scalar_lea.vmem %s2609_s9, 2048  ;;  %s2424_s21 = smov [#allocation2]  }
  0x57   : > { %p2318_p9 = scmp.ne.s32.totalorder %s2609_s9, %s2317_s4  ;;  %s2322_s30 = sshll.u32 %s2424_s21, 4  ;;  %s2323_s30 = int_to_ptr.vmem [resolvable:$false] %s2322_s30 }
  0x58   : > { %s2324_s29 = scalar_lea.vmem %s2323_s30, 4096  ;;  %p2325_p7 = scmp.lt.s32.totalorder %s2609_s9, %s2323_s30 }
  0x59   : > { %p2320_p11 = pnand %p2318_p9, %p2304_p12  ;;  %p2326_p4 = scmp.lt.s32.totalorder %s2324_s29, %s2317_s4 }
  0x5b   : > { %p2321_p0 = pneg %p2320_p11  ;;  %p2327_p13 = por %p2326_p4, %p2325_p7 }
  0x5d   : > { %p2328_p6 = pnand %p2327_p13, %p2321_p0 }
  0x5f   : > { %2331 = shalt.err (!%p2328_p6)
}
  0x60   : > { %2160 = dma.hbm_to_vmem [thread:$0]  (!%p2605_p2), %s2601_s26, 2048, %s2609_s9, %s2611_s19, %s2422_s11, %s2422_s11, %s2423_s18  }
  0x61   : > { %207 = sbr.rel (%p2504_p8) target bundleno = 562 (0x232), region = 32  ;;  %s2645_s28 = sand.u32 (!%p2504_p8), 1, %s2402_s13  }
  0x62   : > { %s1679_s5 = sshll.u32 (!%p2504_p8), %s2645_s28, 7  ;;  %s210_s7 = scalar_lea.sflag (!%p2504_p8), [#allocation3], %s2645_s28 }
  0x63   : > { %s2651_s10 = scalar_lea.vmem (!%p2504_p8), [#allocation2], %s1679_s5  ;;  %p3082_p7 = scmp.ne.s32.totalorder (!%p2504_p8), %s3076_s22, 0 }
  0x68   : > { %2385 = dma.done.wait (%p3082_p7), %s210_s7, 2048  }
  0x69   : > { %2387 = vsyncadd (%p3082_p7), %s210_s7, 4294965248  ;;  %p3083_p2 = scmp.ne.s32.totalorder %s3074_s20, 0 }
  0x6b   : > { %2389 = dma.done.wait (%p3083_p2), [#allocation6], 400  }
  0x6c   : > { %2391 = vsyncadd (%p3083_p2), [#allocation6], 4294966896  ;;  %v2425_v0 = vmov 0   ;;  %vm553_vm0 = vsmask.f32 7424  ;;  %v2227_v1 = vld [vmem:[%s2651_s10] sm:$0xff]  }
  0x6d   : > { %2002 = vmatprep.mubr.bf16.mxu0 %v2425_v0  ;;  %v2228_v2 = vld [vmem:[%s2651_s10 + $0x8] sm:$0xff]   ;;  %vm552_vm1 = vcmask 1047552   ;;  %s2426_s24 = smov 4   ;;  %v358_v3 = vshrl.u32 %v2227_v1, 16  ;;  %v361_v4 = vshll.u32 %v2227_v1, 16  ;;  %v2229_v5 = vld [vmem:[%s2651_s10 + $0x10] sm:$0xff]  }
  0x6e   : > { %571 = vrot.lane.b32.xlu0 %v2227_v1, %s2426_s24  ;;  %v365_v6 = vshrl.u32 %v2228_v2, 16  ;;  %v368_v7 = vshll.u32 %v2228_v2, 16  ;;  %v2230_v8 = vld [vmem:[%s2651_s10 + $0x18] sm:$0xff]   ;;  %vm2667_vm2 = vmand %vm552_vm1, %vm553_vm0  ;;  %v372_v14 = vshrl.u32 %v2229_v5, 16  ;;  %v375_v15 = vshll.u32 %v2229_v5, 16  ;;  %v2231_v17 = vld [vmem:[%s2651_s10 + $0x20] sm:$0xff]  }
  0x6f   : > { %v504_v9 = vrot.slane %v361_v4, 1  ;;  %v360_v10 = vrot.slane %v358_v3, 7  ;;  %v382_v18 = vshll.u32 %v2230_v8, 16  ;;  %s2427_s20 = smov 8   ;;  %v389_v26 = vshll.u32 %v2231_v17, 16  ;;  %v2232_v30 = vld [vmem:[%s2651_s10 + $0x28] sm:$0xff]  }
  0x70   : > { %v367_v12 = vrot.slane %v365_v6, 7  ;;  %v506_v13 = vrot.slane %v368_v7, 1  ;;  %v374_v21 = vrot.slane %v372_v14, 7  ;;  %v508_v22 = vrot.slane %v375_v15, 1  ;;  %v2233_v35 = vld [vmem:[%s2651_s10 + $0x30] sm:$0xff]   ;;  %v2693_v44 = vld [vmem:[%s2651_s10 + $0x38] sm:$0xff]  }
  0x71   : > { %v505_v16 = vor.u32 %v504_v9, %v358_v3  ;;  %v2673_v19 = vor.u32 %v361_v4, %v360_v10  ;;  %v379_v28 = vshrl.u32 %v2230_v8, 16  ;;  %v510_v29 = vrot.slane %v382_v18, 1  ;;  %v2235_v51 = vld [vmem:[%s2651_s10 + $0x40] sm:$0xff]   ;;  %v2710_v57 = vld [vmem:[%s2651_s10 + $0x48] sm:$0xff]   ;;  %v2715_v63 = vld [vmem:[%s2651_s10 + $0x50] sm:$0xff]   ;;  %s2959_s22 = scalar_lea.vmem [#allocation8], %s1679_s5 }
  0x72   : > { %573 = vrot.lane.b32.xlu0 %v2228_v2, %s2426_s24  ;;  %v507_v20 = vor.u32 %v506_v13, %v365_v6  ;;  %v2675_v23 = vor.u32 %v368_v7, %v367_v12  ;;  %v509_v25 = vor.u32 %v508_v22, %v372_v14  ;;  %v2684_v31 = vor.u32 %v375_v15, %v374_v21  ;;  %v2720_v2 = vld [vmem:[%s2651_s10 + $0x58] sm:$0xff]   ;;  %v2239_v22 = vld [vmem:[%s2651_s10 + $0x60] sm:$0xff]   ;;  %s1819_s11 = sshll.u32 %s2410_s15, 11  ;;  %s1563_s18 = sshll.u32 %s2959_s22, 4  ;;  %s3014_s18 = int_to_ptr.vmem [resolvable:$true] %s1563_s18 }
  0x73   : > { %v555_v24 = vsel %vm2667_vm2, %v505_v16, 0  ;;  %v386_v33 = vshrl.u32 %v2231_v17, 16  ;;  %v512_v34 = vrot.slane %v389_v26, 1  ;;  %v381_v36 = vrot.slane %v379_v28, 7  ;;  %v2244_v16 = vld [vmem:[#allocation5 + $0x8] sm:$0x3f]   ;;  %s3012_s19 = scalar_lea.hbm %s3069_s3, %s1819_s11 }
  0x74   : > { %619 = vrot.lane.b32.xlu1 %v555_v24, %s2427_s20  ;;  %v556_v27 = vsel %vm2667_vm2, %v507_v20, 0  ;;  %v557_v32 = vsel %vm2667_vm2, %v509_v25, 0  ;;  %v511_v37 = vor.u32 %v510_v29, %v379_v28  ;;  %v396_v38 = vshll.u32 %v2232_v30, 16  ;;  %v2245_v25 = vld [vmem:[#allocation5 + $0x10] sm:$0x3f]   ;;  %s1549_s15 = scalar_lea.sflag [#allocation4], %s2645_s28 }
  0x75   : > { %v513_v39 = vor.u32 %v512_v34, %v386_v33  ;;  %v393_v40 = vshrl.u32 %v2232_v30, 16  ;;  %v403_v41 = vshll.u32 %v2233_v35, 16  ;;  %v388_v42 = vrot.slane %v386_v33, 7  ;;  %v2240_v34 = vld [vmem:[%s2651_s10 + $0x68] sm:$0xff]   ;;  %s2332_s8 = scalar_lea.vmem %s3014_s18, 2048  ;;  %p3088_p12 = scmp.ne.s32.totalorder %s3080_s27, 0 }
  0x76   : > { %575 = vrot.lane.b32.xlu0 %v2229_v5, %s2426_s24  ;;  %v558_v45 = vsel %vm2667_vm2, %v511_v37, 0  ;;  %v514_v46 = vrot.slane %v396_v38, 1  ;;  %v2698_v47 = vor.u32 %v382_v18, %v381_v36  ;;  %v400_v49 = vshrl.u32 %v2233_v35, 16  ;;  %p2333_p8 = scmp.ne.s32.totalorder %s3014_s18, %s2332_s8  ;;  %s2428_s4 = smov [#allocation8]  }
  0x77   : > { %v395_v43 = vrot.slane %v393_v40, 7  ;;  %v559_v48 = vsel %vm2667_vm2, %v513_v39, 0  ;;  %v516_v50 = vrot.slane %v403_v41, 1  ;;  %v2704_v53 = vor.u32 %v389_v26, %v388_v42  ;;  %s2336_s21 = sshll.u32 %s2428_s4, 4  ;;  %s2337_s21 = int_to_ptr.vmem [resolvable:$false] %s2336_s21 }
  0x78   : > { %621 = vrot.lane.b32.xlu1 %v556_v27, %s2427_s20  ;;  %v402_v52 = vrot.slane %v400_v49, 7  ;;  %v515_v54 = vor.u32 %v514_v46, %v393_v40  ;;  %v407_v55 = vshrl.u32 %v2693_v44, 16  ;;  %v410_v56 = vshll.u32 %v2693_v44, 16  ;;  %v2241_v46 = vld [vmem:[%s2651_s10 + $0x70] sm:$0xff]   ;;  %p2334_p1 = pnand %p2333_p8, %p3088_p12  ;;  %s2338_s30 = scalar_lea.vmem %s2337_s21, 4096 }
  0x79   : > { %v2712_v58 = vor.u32 %v396_v38, %v395_v43  ;;  %v517_v59 = vor.u32 %v516_v50, %v400_v49  ;;  %v417_v60 = vshll.u32 %v2235_v51, 16  ;;  %v414_v62 = vshrl.u32 %v2235_v51, 16  ;;  %p2339_p3 = scmp.lt.s32.totalorder %s3014_s18, %s2337_s21  ;;  %p2340_p5 = scmp.lt.s32.totalorder %s2338_s30, %s2332_s8 }
  0x7a   : > { %623 = vrot.lane.b32.xlu0 %v557_v32, %s2427_s20  ;;  %v409_v61 = vrot.slane %v407_v55, 7  ;;  %v421_v1 = vshrl.u32 %v2710_v57, 16  ;;  %vm776_vm3 = vcmask 1045504   ;;  %v2722_v3 = vor.u32 %v403_v41, %v402_v52  ;;  %v2242_v52 = vld [vmem:[%s2651_s10 + $0x78] sm:$0xff]   ;;  %p2335_p10 = pneg %p2334_p1 }
  0x7b   : > { %v560_v4 = vsel %vm2667_vm2, %v515_v54, 0  ;;  %v518_v5 = vrot.slane %v410_v56, 1  ;;  %v416_v6 = vrot.slane %v414_v62, 7  ;;  %v561_v9 = vsel %vm2667_vm2, %v517_v59, 0  ;;  %2134 = vmatprep.subr.msk.bf16.mxu1 %vm776_vm3, %v2244_v16  ;;  %p2341_p9 = por %p2340_p5, %p2339_p3 }
  0x7c   : > { %577 = vrot.lane.b32.xlu1 %v2230_v8, %s2426_s24  ;;  %v423_v7 = vrot.slane %v421_v1, 7  ;;  %v2243_v8 = vld [vmem:[#allocation5] sm:$0x3f]   ;;  %v520_v10 = vrot.slane %v417_v60, 1  ;;  %v428_v12 = vshrl.u32 %v2715_v63, 16  ;;  %v435_v13 = vshrl.u32 %v2720_v2, 16 }
  0x7d   : > { %v424_v14 = vshll.u32 %v2710_v57, 16  ;;  %2135 = vmatprep.subr.msk.bf16.mxu0 %vm776_vm3, %v2243_v8  ;;  %v2734_v15 = vsel %vm776_vm3, %v2243_v8, 0  ;;  %v519_v21 = vor.u32 %v518_v5, %v407_v55  ;;  %v778_v24 = vsel %vm776_vm3, %v2244_v16, 0  ;;  %p2342_p11 = pnand %p2341_p9, %p2335_p10 }
  0x7e   : > { %579 = vrot.lane.b32.xlu0 %v2231_v17, %s2426_s24  ;;  %v2736_v17 = vor.u32 %v410_v56, %v409_v61  ;;  %v430_v18 = vrot.slane %v428_v12, 7  ;;  %v437_v20 = vrot.slane %v435_v13, 7  ;;  %2001 = vmatpush3.bf16.msra.mxu0 %v2734_v15  ;;  %v2744_v26 = vor.u32 %v417_v60, %v416_v6 }
  0x7f   : > { %v2746_v27 = vor.u32 %v424_v14, %v423_v7  ;;  %v521_v28 = vor.u32 %v520_v10, %v414_v62  ;;  %v431_v29 = vshll.u32 %v2715_v63, 16  ;;  %1967 = vmatpush3.bf16.msra.mxu1 %v778_v24  ;;  %v442_v32 = vshrl.u32 %v2239_v22, 16  ;;  %2137 = vmatprep.subr.msk.bf16.mxu0 %vm776_vm3, %v2245_v25 }
  0x80   : > { %625 = vrot.lane.b32.xlu1 %v558_v45, %s2427_s20  ;;  %2136 = vmatprep.subr.msk.bf16.mxu1 %vm776_vm3, %v2243_v8  ;;  %v2753_v33 = vsel %vm776_vm3, %v2245_v25, 0  ;;  %v562_v37 = vsel %vm2667_vm2, %v519_v21, 0  ;;  %v522_v38 = vrot.slane %v424_v14, 1  ;;  %v449_v42 = vshrl.u32 %v2240_v34, 16 }
  0x81   : > { %v444_v39 = vrot.slane %v442_v32, 7  ;;  %v563_v40 = vsel %vm2667_vm2, %v521_v28, 0  ;;  %v524_v41 = vrot.slane %v431_v29, 1  ;;  %v445_v43 = vshll.u32 %v2239_v22, 16 }
  0x82   : > { %627 = vrot.lane.b32.xlu0 %v559_v48, %s2427_s20  ;;  %v523_v45 = vor.u32 %v522_v38, %v421_v1  ;;  %v452_v50 = vshll.u32 %v2240_v34, 16  ;;  %v463_v62 = vshrl.u32 %v2242_v52, 16  ;;  %v459_v1 = vshll.u32 %v2241_v46, 16 }
  0x83   : > { %v2770_v48 = vor.u32 %v445_v43, %v444_v39  ;;  %v525_v49 = vor.u32 %v524_v41, %v428_v12  ;;  %v528_v61 = vrot.slane %v445_v43, 1  ;;  %v466_v6 = vshll.u32 %v2242_v52, 16 }
  0x84   : > { %581 = vrot.lane.b32.xlu1 %v2232_v30, %s2426_s24  ;;  %v438_v30 = vshll.u32 %v2720_v2, 16  ;;  %v564_v55 = vsel %vm2667_vm2, %v523_v45, 0  ;;  %v532_v12 = vrot.slane %v459_v1, 1  ;;  %vm485_vm4 = vcmask 1040384  }
  0x85   : > { %v565_v60 = vsel %vm2667_vm2, %v525_v49, 0  ;;  %v534_v16 = vrot.slane %v466_v6, 1  ;;  %vm486_vm5 = vsmask.f32 256  ;;  %vm651_vm7 = vcmask 31744  }
  0x86   : > { %583 = vrot.lane.b32.xlu0 %v2233_v35, %s2426_s24  ;;  %v2758_v35 = vor.u32 %v431_v29, %v430_v18  ;;  %v2760_v36 = vor.u32 %v438_v30, %v437_v20  ;;  %v526_v56 = vrot.slane %v438_v30, 1  ;;  %vm2810_vm6 = vmand %vm485_vm4, %vm486_vm5  ;;  %vm700_vm8 = vcmask 64512  }
  0x87   : > { %v535_v20 = vor.u32 %v534_v16, %v463_v62  ;;  %v488_v25 = vsel %vm2810_vm6, 0, %v2673_v19  ;;  %v489_v11 = vsel %vm2810_vm6, 0, %v2675_v23  ;;  %vm743_vm9 = vcmask 97280  }
  0x88   : > { %629 = vrot.lane.b32.xlu1 %v560_v4, %s2427_s20  ;;  %v527_v4 = vor.u32 %v526_v56, %v435_v13 }
  0x89   : > { %v570_v21 = vsel %vm2667_vm2, %v535_v20, 0 }
  0x8a   : > { %631 = vrot.lane.b32.xlu0 %v561_v9, %s2427_s20  ;;  %v566_v8 = vsel %vm2667_vm2, %v527_v4, 0  ;;  %v530_v9 = vrot.slane %v452_v50, 1 }
  0x8c   : > { %585 = vrot.lane.b32.xlu1 %v2693_v44, %s2426_s24  ;;  %v451_v44 = vrot.slane %v449_v42, 7  ;;  %v531_v13 = vor.u32 %v530_v9, %v449_v42  ;;  %v492_v42 = vsel %vm2810_vm6, 0, %v2704_v53 }
  0x8e   : > { %587 = vrot.lane.b32.xlu0 %v2235_v51, %s2426_s24  ;;  %v456_v51 = vshrl.u32 %v2241_v46, 16  ;;  %v2775_v54 = vor.u32 %v452_v50, %v451_v44  ;;  %v494_v50 = vsel %vm2810_vm6, 0, %v2722_v3 }
  0x90   : > { %633 = vrot.lane.b32.xlu1 %v562_v37, %s2427_s20  ;;  %v458_v59 = vrot.slane %v456_v51, 7  ;;  %v533_v14 = vor.u32 %v532_v12, %v456_v51  ;;  %v493_v51 = vsel %vm2810_vm6, 0, %v2712_v58  ;;  %v497_v12 = vsel %vm2810_vm6, 0, %v2746_v27 }
  0x92   : > { %635 = vrot.lane.b32.xlu0 %v563_v40, %s2427_s20  ;;  %v2785_v5 = vor.u32 %v459_v1, %v458_v59  ;;  %v569_v18 = vsel %vm2667_vm2, %v533_v14, 0  ;;  %v495_v1 = vsel %vm2810_vm6, 0, %v2736_v17 }
  0x94   : > { %589 = vrot.lane.b32.xlu1 %v2710_v57, %s2426_s24  ;;  %v465_v57 = vrot.slane %v463_v62, 7  ;;  %v496_v62 = vsel %vm2810_vm6, 0, %v2744_v26 }
  0x96   : > { %591 = vrot.lane.b32.xlu0 %v2715_v63, %s2426_s24  ;;  %v529_v63 = vor.u32 %v528_v61, %v442_v32  ;;  %v2789_v7 = vor.u32 %v466_v6, %v465_v57  ;;  %v490_v32 = vsel %vm2810_vm6, 0, %v2684_v31 }
  0x98   : > { %637 = vrot.lane.b32.xlu1 %v564_v55, %s2427_s20  ;;  %v567_v10 = vsel %vm2667_vm2, %v529_v63, 0 }
  0x9a   : > { %639 = vrot.lane.b32.xlu0 %v565_v60, %s2427_s20 }
  0x9c   : > { %593 = vrot.lane.b32.xlu1 %v2720_v2, %s2426_s24  ;;  %v568_v2 = vsel %vm2667_vm2, %v531_v13, 0 }
  0x9e   : > { %595 = vrot.lane.b32.xlu0 %v2239_v22, %s2426_s24 }
  0xa0   : > { %641 = vrot.lane.b32.xlu1 %v566_v8, %s2427_s20 }
  0xa2   : > { %643 = vrot.lane.b32.xlu0 %v567_v10, %s2427_s20  ;;  %v498_v10 = vsel %vm2810_vm6, 0, %v2758_v35 }
  0xa4   : > { %597 = vrot.lane.b32.xlu1 %v2240_v34, %s2426_s24 }
  0xa6   : > { %599 = vrot.lane.b32.xlu0 %v2241_v46, %s2426_s24 }
  0xa8   : > { %645 = vrot.lane.b32.xlu1 %v568_v2, %s2427_s20 }
  0xaa   : > { %647 = vrot.lane.b32.xlu0 %v569_v18, %s2427_s20 }
  0xac   : > { %601 = vrot.lane.b32.xlu1 %v2242_v52, %s2426_s24 }
  0xb0   : > { %649 = vrot.lane.b32.xlu1 %v570_v21, %s2427_s20  ;;  %v500_v21 = vsel %vm2810_vm6, 0, %v2770_v48 }
  0xe0   : > { %v572_v24 = vpop.permute.xlu0 %571 }
  0xe1   : > { %v654_v29 = vsel %vm651_vm7, %v488_v25, %v572_v24  ;;  %v499_v24 = vsel %vm2810_vm6, 0, %v2760_v36 }
  0xe4   : > { %v574_v28 = vpop.permute.xlu0 %573 }
  0xe5   : > { %v657_v38 = vsel %vm651_vm7, %v489_v11, %v574_v28 }
  0xe6   : > { %v620_v30 = vpop.permute.xlu1 %619 }
  0xe7   : > { %v702_v34 = vsel %vm700_vm8, %v654_v29, %v620_v30 }
  0xe8   : > { %v576_v37 = vpop.permute.xlu0 %575  ;;  %1968 = vmatprep.mubr.msk.bf16.mxu1 %vm743_vm9, %v702_v34  ;;  %2003 = vmatmul.mubr.msk.bf16.vlgmr.msra.gmra.mrb[0].mxu0 %vm743_vm9, %v702_v34  ;;  %v502_v34 = vsel %vm2810_vm6, 0, %v2785_v5 }
  0xe9   : > { %v660_v19 = vsel %vm651_vm7, %v490_v32, %v576_v37  ;;  %2035 = vmatpush3.bf16.msra.mxu0 %v2753_v33  ;;  %v491_v33 = vsel %vm2810_vm6, 0, %v2698_v47  ;;  %v501_v37 = vsel %vm2810_vm6, 0, %v2775_v54 }
  0xea   : > { %v622_v23 = vpop.permute.xlu1 %621 }
  0xeb   : > { %v704_v39 = vsel %vm700_vm8, %v657_v38, %v622_v23 }
  0xec   : > { %v624_v40 = vpop.permute.xlu0 %623  ;;  %1969 = vmatmul.mubr.msk.bf16.vlgmr.msra.gmra.mrb[0].mxu1 %vm743_vm9, %v704_v39  ;;  %2006 = vmatprep.mubr.msk.bf16.mxu0 %vm743_vm9, %v704_v39 }
  0xed   : > { %v706_v31 = vsel %vm700_vm8, %v660_v19, %v624_v40  ;;  %2069 = vmatpush3.bf16.msra.mxu1 %v2734_v15 }
  0xee   : > { %1972 = vmatprep.mubr.msk.bf16.mxu1 %vm743_vm9, %v706_v31  ;;  %v578_v41 = vpop.permute.xlu1 %577 }
  0xef   : > { %v663_v45 = vsel %vm651_vm7, %v491_v33, %v578_v41  ;;  %v503_v41 = vsel %vm2810_vm6, 0, %v2789_v7 }
  0xf0   : > { %v580_v43 = vpop.permute.xlu0 %579  ;;  %2007 = vmatmul.mubr.msk.bf16.gmra.mrb[4].mxu0 %vm743_vm9, %v706_v31 }
  0xf1   : > { %v666_v44 = vsel %vm651_vm7, %v492_v42, %v580_v43 }
  0xf2   : > { %v626_v46 = vpop.permute.xlu1 %625 }
  0xf3   : > { %v708_v15 = vsel %vm700_vm8, %v663_v45, %v626_v46 }
  0xf4   : > { %v628_v49 = vpop.permute.xlu0 %627  ;;  %1973 = vmatmul.mubr.msk.bf16.gmra.mrb[4].mxu1 %vm743_vm9, %v708_v15  ;;  %2010 = vmatprep.mubr.msk.bf16.mxu0 %vm743_vm9, %v708_v15 }
  0xf5   : > { %v710_v53 = vsel %vm700_vm8, %v666_v44, %v628_v49 }
  0xf6   : > { %1976 = vmatprep.mubr.msk.bf16.mxu1 %vm743_vm9, %v710_v53  ;;  %v582_v47 = vpop.permute.xlu1 %581 }
  0xf7   : > { %v669_v56 = vsel %vm651_vm7, %v493_v51, %v582_v47 }
  0xf8   : > { %v584_v52 = vpop.permute.xlu0 %583  ;;  %2011 = vmatmul.mubr.msk.bf16.gmra.mrb[8].mxu0 %vm743_vm9, %v710_v53 }
  0xf9   : > { %v672_v55 = vsel %vm651_vm7, %v494_v50, %v584_v52 }
  0xfa   : > { %v630_v59 = vpop.permute.xlu1 %629 }
  0xfb   : > { %v712_v60 = vsel %vm700_vm8, %v669_v56, %v630_v59 }
  0xfc   : > { %v632_v61 = vpop.permute.xlu0 %631  ;;  %1977 = vmatmul.mubr.msk.bf16.gmra.mrb[8].mxu1 %vm743_vm9, %v712_v60  ;;  %2014 = vmatprep.mubr.msk.bf16.mxu0 %vm743_vm9, %v712_v60 }
  0xfd   : > { %v714_v3 = vsel %vm700_vm8, %v672_v55, %v632_v61  ;;  %v2951_v61 = vld [vmem:[#allocation7] ss:$0 sm:$0xff] }
  0xfe   : > { %1980 = vmatprep.mubr.msk.bf16.mxu1 %vm743_vm9, %v714_v3  ;;  %v586_v58 = vpop.permute.xlu1 %585 }
  0xff   : > { %v675_v63 = vsel %vm651_vm7, %v495_v1, %v586_v58 }
 0x100   : > { %v588_v57 = vpop.permute.xlu0 %587  ;;  %2015 = vmatmul.mubr.msk.bf16.gmra.mrb[12].mxu0 %vm743_vm9, %v714_v3 }
 0x101   : > { %2036 = vmatprep.mubr.msk.bf16.mxu0 %vm743_vm9, %v704_v39  ;;  %v678_v4 = vsel %vm651_vm7, %v496_v62, %v588_v57 }
 0x102   : > { %v634_v6 = vpop.permute.xlu1 %633 }
 0x103   : > { %v716_v8 = vsel %vm700_vm8, %v675_v63, %v634_v6 }
 0x104   : > { %v636_v9 = vpop.permute.xlu0 %635  ;;  %1981 = vmatmul.mubr.msk.bf16.gmra.mrb[12].mxu1 %vm743_vm9, %v716_v8 }
 0x105   : > { %v718_v26 = vsel %vm700_vm8, %v678_v4, %v636_v9 }
 0x106   : > { %1984 = vmatprep.mubr.msk.bf16.mxu1 %vm743_vm9, %v718_v26  ;;  %v590_v17 = vpop.permute.xlu1 %589 }
 0x107   : > { %v681_v2 = vsel %vm651_vm7, %v497_v12, %v590_v17 }
 0x108   : > { %v592_v13 = vpop.permute.xlu0 %591  ;;  %2037 = vmatmul.mubr.msk.bf16.vlgmr.msra.gmra.mrb[0].mxu0 %vm743_vm9, %v706_v31 }
 0x109   : > { %2040 = vmatprep.mubr.msk.bf16.mxu0 %vm743_vm9, %v708_v15  ;;  %v684_v14 = vsel %vm651_vm7, %v498_v10, %v592_v13 }
 0x10a   : > { %v638_v16 = vpop.permute.xlu1 %637 }
 0x10b   : > { %v720_v18 = vsel %vm700_vm8, %v681_v2, %v638_v16 }
 0x10c   : > { %v640_v20 = vpop.permute.xlu0 %639  ;;  %1985 = vmatmul.mubr.msk.bf16.gmra.mrb[16].mxu1 %vm743_vm9, %v720_v18 }
 0x10d   : > { %v722_v35 = vsel %vm700_vm8, %v684_v14, %v640_v20 }
 0x10e   : > { %1988 = vmatprep.mubr.msk.bf16.mxu1 %vm743_vm9, %v722_v35  ;;  %v594_v27 = vpop.permute.xlu1 %593 }
 0x10f   : > { %v687_v29 = vsel %vm651_vm7, %v499_v24, %v594_v27 }
 0x110   : > { %v596_v25 = vpop.permute.xlu0 %595  ;;  %2041 = vmatmul.mubr.msk.bf16.gmra.mrb[4].mxu0 %vm743_vm9, %v710_v53 }
 0x111   : > { %2044 = vmatprep.mubr.msk.bf16.mxu0 %vm743_vm9, %v712_v60  ;;  %v690_v28 = vsel %vm651_vm7, %v500_v21, %v596_v25 }
 0x112   : > { %v642_v11 = vpop.permute.xlu1 %641 }
 0x113   : > { %v724_v30 = vsel %vm700_vm8, %v687_v29, %v642_v11 }
 0x114   : > { %v644_v32 = vpop.permute.xlu0 %643  ;;  %1989 = vmatmul.mubr.msk.bf16.gmra.mrb[20].mxu1 %vm743_vm9, %v724_v30 }
 0x115   : > { %v726_v48 = vsel %vm700_vm8, %v690_v28, %v644_v32 }
 0x116   : > { %1992 = vmatprep.mubr.msk.bf16.mxu1 %vm743_vm9, %v726_v48  ;;  %v598_v36 = vpop.permute.xlu1 %597 }
 0x117   : > { %v693_v23 = vsel %vm651_vm7, %v501_v37, %v598_v36 }
 0x118   : > { %v600_v38 = vpop.permute.xlu0 %599  ;;  %2045 = vmatmul.mubr.msk.bf16.gmra.mrb[8].mxu0 %vm743_vm9, %v714_v3 }
 0x119   : > { %2048 = vmatprep.mubr.msk.bf16.mxu0 %vm743_vm9, %v716_v8  ;;  %v696_v19 = vsel %vm651_vm7, %v502_v34, %v600_v38 }
 0x11a   : > { %v646_v39 = vpop.permute.xlu1 %645 }
 0x11b   : > { %v728_v40 = vsel %vm700_vm8, %v693_v23, %v646_v39 }
 0x11c   : > { %v648_v31 = vpop.permute.xlu0 %647  ;;  %1993 = vmatmul.mubr.msk.bf16.gmra.mrb[24].mxu1 %vm743_vm9, %v728_v40 }
 0x11d   : > { %v730_v5 = vsel %vm700_vm8, %v696_v19, %v648_v31 }
 0x11e   : > { %1996 = vmatprep.mubr.msk.bf16.mxu1 %vm743_vm9, %v730_v5  ;;  %v602_v54 = vpop.permute.xlu1 %601 }
 0x11f   : > { %v699_v42 = vsel %vm651_vm7, %v503_v41, %v602_v54 }
 0x120   : > { %2049 = vmatmul.mubr.msk.bf16.gmra.mrb[12].mxu0 %vm743_vm9, %v718_v26 }
 0x121   : > { %2052 = vmatprep.mubr.msk.bf16.mxu0 %vm743_vm9, %v720_v18 }
 0x122   : > { %v650_v33 = vpop.permute.xlu1 %649 }
 0x123   : > { %v732_v43 = vsel %vm700_vm8, %v699_v42, %v650_v33 }
 0x124   : > { %1997 = vmatmul.mubr.msk.bf16.gmra.mrb[28].mxu1 %vm743_vm9, %v732_v43 }
 0x125   : > { %2018 = vmatprep.mubr.msk.bf16.mxu1 %vm743_vm9, %v716_v8 }
 0x128   : > { %2053 = vmatmul.mubr.msk.bf16.gmra.mrb[16].mxu0 %vm743_vm9, %v722_v35 }
 0x129   : > { %2056 = vmatprep.mubr.msk.bf16.mxu0 %vm743_vm9, %v724_v30 }
 0x12c   : > { %2019 = vmatmul.mubr.msk.bf16.vlgmr.msra.gmra.mrb[16].mxu1 %vm743_vm9, %v718_v26 }
 0x12d   : > { %2022 = vmatprep.mubr.msk.bf16.mxu1 %vm743_vm9, %v720_v18 }
 0x130   : > { %2057 = vmatmul.mubr.msk.bf16.gmra.mrb[20].mxu0 %vm743_vm9, %v726_v48 }
 0x131   : > { %2060 = vmatprep.mubr.msk.bf16.mxu0 %vm743_vm9, %v728_v40 }
 0x134   : > { %2023 = vmatmul.mubr.msk.bf16.gmra.mrb[20].mxu1 %vm743_vm9, %v722_v35 }
 0x135   : > { %2026 = vmatprep.mubr.msk.bf16.mxu1 %vm743_vm9, %v724_v30 }
 0x138   : > { %2061 = vmatmul.mubr.msk.bf16.gmra.mrb[24].mxu0 %vm743_vm9, %v730_v5 }
 0x139   : > { %2064 = vmatprep.mubr.msk.bf16.mxu0 %vm743_vm9, %v732_v43 }
 0x13c   : > { %2027 = vmatmul.mubr.msk.bf16.gmra.mrb[24].mxu1 %vm743_vm9, %v726_v48 }
 0x13d   : > { %2030 = vmatprep.mubr.msk.bf16.mxu1 %vm743_vm9, %v728_v40 }
 0x140   : > { %2065 = vmatmul.mubr.bf16.gmra.mrb[28].mxu0 %v2425_v0 }
 0x144   : > { %2031 = vmatmul.mubr.msk.bf16.gmra.mrb[28].mxu1 %vm743_vm9, %v730_v5 }
 0x1bf   : > { %v1970_v7 = vpop.f32.mrb[0].mxu1 }
 0x1c0   : > { %v814_v22 = vpop.f32.mrb[1].mxu1 }
 0x1c1   : > { %v1971_v44 = vpop.f32.mrb[2].mxu1 }
 0x1c2   : > { %v817_v45 = vpop.f32.mrb[3].mxu1 }
 0x1c7   : > { %v1974_v46 = vpop.f32.mrb[4].mxu1 }
 0x1c8   : > { %v830_v15 = vpop.f32.mrb[5].mxu1 }
 0x1c9   : > { %v1975_v49 = vpop.f32.mrb[6].mxu1 }
 0x1ca   : > { %v833_v53 = vpop.f32.mrb[7].mxu1 }
 0x1cf   : > { %v1978_v47 = vpop.f32.mrb[8].mxu1 }
 0x1d0   : > { %v846_v50 = vpop.f32.mrb[9].mxu1 }
 0x1d1   : > { %v1979_v51 = vpop.f32.mrb[10].mxu1 }
 0x1d2   : > { %v849_v52 = vpop.f32.mrb[11].mxu1 }
 0x1d7   : > { %v2943_v55 = vpop.f32.mrb[12].mxu1 }
 0x1d8   : > { %v2945_v56 = vpop.f32.mrb[13].mxu1 }
 0x1d9   : > { %v2947_v59 = vpop.f32.mrb[14].mxu1 }
 0x1da   : > { %v2949_v0 = vpop.f32.mrb[15].mxu1 }
 0x1db   : > { %v2038_v60 = vpop.f32.mrb[0].mxu0 }
 0x1dc   : > { %v2070_v3 = vadd.f32 %v2038_v60, %v1970_v7  ;;  %v1158_v58 = vpop.f32.mrb[1].mxu0 }
 0x1dd   : > { %v2071_v62 = vadd.f32 %v1158_v58, %v814_v22  ;;  %v2039_v1 = vpop.f32.mrb[2].mxu0 }
 0x1de   : > { %v1326_v57 = vadd.f32 %v2070_v3, %v2951_v61  ;;  %v2072_v4 = vadd.f32 %v2039_v1, %v1971_v44  ;;  %v1161_v63 = vpop.f32.mrb[3].mxu0 }
 0x1df   : > { %v1324_v6 = vadd.f32 %v2071_v62, %v2951_v61  ;;  %v2073_v8 = vadd.f32 %v1161_v63, %v817_v45 }
 0x1e0   : > { %v1327_v9 = vadd.f32 %v2072_v4, %v2951_v61  ;;  %v1358_v17 = vmax.f32 %v1326_v57, 0.0 }
 0x1e1   : > { %v1325_v26 = vadd.f32 %v2073_v8, %v2951_v61  ;;  %v1356_v12 = vmax.f32 %v1324_v6, 0.0 }
 0x1e2   : > { %v1359_v10 = vmax.f32 %v1327_v9, 0.0 }
 0x1e3   : > { %v1357_v13 = vmax.f32 %v1325_v26, 0.0  ;;  %v2042_v14 = vpop.f32.mrb[4].mxu0 }
 0x1e4   : > { %v1828_v2 = vpack.c.bf16 %v1359_v10, %v1358_v17  ;;  %v2074_v16 = vadd.f32 %v2042_v14, %v1974_v46  ;;  %v1174_v18 = vpop.f32.mrb[5].mxu0 }
 0x1e5   : > { %v1823_v20 = vpack.c.bf16 %v1357_v13, %v1356_v12  ;;  %v2075_v35 = vadd.f32 %v1174_v18, %v830_v15  ;;  %v2043_v27 = vpop.f32.mrb[6].mxu0 }
 0x1e6   : > { %1900 = vst [vmem:[%s2959_s22 + $0x8] sm:$0xff] %v1828_v2   ;;  %v1330_v21 = vadd.f32 %v2074_v16, %v2951_v61  ;;  %v2076_v24 = vadd.f32 %v2043_v27, %v1975_v49  ;;  %v1177_v25 = vpop.f32.mrb[7].mxu0 }
 0x1e7   : > { %1824 = vst [vmem:[%s2959_s22] sm:$0xff] %v1823_v20   ;;  %v1328_v28 = vadd.f32 %v2075_v35, %v2951_v61  ;;  %v2077_v29 = vadd.f32 %v1177_v25, %v833_v53 }
 0x1e8   : > { %v1331_v11 = vadd.f32 %v2076_v24, %v2951_v61  ;;  %v1362_v32 = vmax.f32 %v1330_v21, 0.0 }
 0x1e9   : > { %v1329_v30 = vadd.f32 %v2077_v29, %v2951_v61  ;;  %v1360_v36 = vmax.f32 %v1328_v28, 0.0 }
 0x1ea   : > { %v1363_v48 = vmax.f32 %v1331_v11, 0.0 }
 0x1eb   : > { %v1361_v34 = vmax.f32 %v1329_v30, 0.0  ;;  %v2046_v37 = vpop.f32.mrb[8].mxu0 }
 0x1ec   : > { %v1838_v38 = vpack.c.bf16 %v1363_v48, %v1362_v32  ;;  %v2078_v19 = vadd.f32 %v2046_v37, %v1978_v47  ;;  %v1190_v23 = vpop.f32.mrb[9].mxu0 }
 0x1ed   : > { %v1833_v39 = vpack.c.bf16 %v1361_v34, %v1360_v36  ;;  %v2079_v40 = vadd.f32 %v1190_v23, %v846_v50  ;;  %v2047_v31 = vpop.f32.mrb[10].mxu0 }
 0x1ee   : > { %1902 = vst [vmem:[%s2959_s22 + $0x18] sm:$0xff] %v1838_v38   ;;  %v1334_v5 = vadd.f32 %v2078_v19, %v2951_v61  ;;  %v2080_v54 = vadd.f32 %v2047_v31, %v1979_v51  ;;  %v1193_v41 = vpop.f32.mrb[11].mxu0 }
 0x1ef   : > { %1901 = vst [vmem:[%s2959_s22 + $0x10] sm:$0xff] %v1833_v39   ;;  %v1332_v42 = vadd.f32 %v2079_v40, %v2951_v61  ;;  %v2081_v33 = vadd.f32 %v1193_v41, %v849_v52 }
 0x1f0   : > { %v1335_v43 = vadd.f32 %v2080_v54, %v2951_v61  ;;  %v1366_v22 = vmax.f32 %v1334_v5, 0.0 }
 0x1f1   : > { %v1333_v7 = vadd.f32 %v2081_v33, %v2951_v61  ;;  %v1364_v45 = vmax.f32 %v1332_v42, 0.0 }
 0x1f2   : > { %v1367_v44 = vmax.f32 %v1335_v43, 0.0 }
 0x1f3   : > { %v1365_v46 = vmax.f32 %v1333_v7, 0.0  ;;  %v2050_v15 = vpop.f32.mrb[12].mxu0 }
 0x1f4   : > { %v1848_v49 = vpack.c.bf16 %v1367_v44, %v1366_v22  ;;  %v2082_v53 = vadd.f32 %v2050_v15, %v2943_v55  ;;  %v1206_v47 = vpop.f32.mrb[13].mxu0 }
 0x1f5   : > { %v1843_v50 = vpack.c.bf16 %v1365_v46, %v1364_v45  ;;  %v2083_v51 = vadd.f32 %v1206_v47, %v2945_v56  ;;  %v2051_v60 = vpop.f32.mrb[14].mxu0 }
 0x1f6   : > { %1904 = vst [vmem:[%s2959_s22 + $0x28] sm:$0xff] %v1848_v49   ;;  %v1338_v52 = vadd.f32 %v2082_v53, %v2951_v61  ;;  %v2084_v3 = vadd.f32 %v2051_v60, %v2947_v59  ;;  %v1209_v58 = vpop.f32.mrb[15].mxu0 }
 0x1f7   : > { %1903 = vst [vmem:[%s2959_s22 + $0x20] sm:$0xff] %v1843_v50   ;;  %v1336_v62 = vadd.f32 %v2083_v51, %v2951_v61  ;;  %v2085_v1 = vadd.f32 %v1209_v58, %v2949_v0 }
 0x1f8   : > { %v1339_v55 = vadd.f32 %v2084_v3, %v2951_v61  ;;  %v1370_v4 = vmax.f32 %v1338_v52, 0.0 }
 0x1f9   : > { %v1337_v57 = vadd.f32 %v2085_v1, %v2951_v61  ;;  %v1368_v63 = vmax.f32 %v1336_v62, 0.0 }
 0x1fa   : > { %v1371_v56 = vmax.f32 %v1339_v55, 0.0 }
 0x1fb   : > { %v1369_v6 = vmax.f32 %v1337_v57, 0.0  ;;  %v2054_v8 = vpop.f32.mrb[16].mxu0 }
 0x1fc   : > { %v1858_v9 = vpack.c.bf16 %v1371_v56, %v1370_v4  ;;  %v1222_v26 = vpop.f32.mrb[17].mxu0 }
 0x1fd   : > { %v1853_v59 = vpack.c.bf16 %v1369_v6, %v1368_v63  ;;  %v2055_v17 = vpop.f32.mrb[18].mxu0 }
 0x1fe   : > { %1906 = vst [vmem:[%s2959_s22 + $0x38] sm:$0xff] %v1858_v9   ;;  %v1225_v10 = vpop.f32.mrb[19].mxu0 }
 0x1ff   : > { %1905 = vst [vmem:[%s2959_s22 + $0x30] sm:$0xff] %v1853_v59   ;;  %v2020_v12 = vpop.f32.mrb[16].mxu1 }
 0x200   : > { %v2086_v13 = vadd.f32 %v2054_v8, %v2020_v12  ;;  %v1050_v14 = vpop.f32.mrb[17].mxu1 }
 0x201   : > { %v2087_v0 = vadd.f32 %v1222_v26, %v1050_v14  ;;  %v2021_v2 = vpop.f32.mrb[18].mxu1 }
 0x202   : > { %v1342_v16 = vadd.f32 %v2086_v13, %v2951_v61  ;;  %v2088_v18 = vadd.f32 %v2055_v17, %v2021_v2  ;;  %v1053_v20 = vpop.f32.mrb[19].mxu1 }
 0x203   : > { %v1340_v35 = vadd.f32 %v2087_v0, %v2951_v61  ;;  %v2089_v27 = vadd.f32 %v1225_v10, %v1053_v20  ;;  %v2058_v21 = vpop.f32.mrb[20].mxu0 }
 0x204   : > { %v1343_v24 = vadd.f32 %v2088_v18, %v2951_v61  ;;  %v1238_v25 = vpop.f32.mrb[21].mxu0  ;;  %v1374_v11 = vmax.f32 %v1342_v16, 0.0 }
 0x205   : > { %v1341_v28 = vadd.f32 %v2089_v27, %v2951_v61  ;;  %v2059_v29 = vpop.f32.mrb[22].mxu0  ;;  %v1372_v48 = vmax.f32 %v1340_v35, 0.0 }
 0x206   : > { %v1375_v30 = vmax.f32 %v1343_v24, 0.0  ;;  %v1241_v32 = vpop.f32.mrb[23].mxu0 }
 0x207   : > { %v1373_v36 = vmax.f32 %v1341_v28, 0.0  ;;  %v2024_v34 = vpop.f32.mrb[20].mxu1 }
 0x208   : > { %v1868_v37 = vpack.c.bf16 %v1375_v30, %v1374_v11  ;;  %v2090_v38 = vadd.f32 %v2058_v21, %v2024_v34  ;;  %v1066_v19 = vpop.f32.mrb[21].mxu1 }
 0x209   : > { %v1863_v23 = vpack.c.bf16 %v1373_v36, %v1372_v48  ;;  %v2091_v39 = vadd.f32 %v1238_v25, %v1066_v19  ;;  %v2025_v40 = vpop.f32.mrb[22].mxu1 }
 0x20a   : > { %1908 = vst [vmem:[%s2959_s22 + $0x48] sm:$0xff] %v1868_v37   ;;  %v1346_v31 = vadd.f32 %v2090_v38, %v2951_v61  ;;  %v2092_v5 = vadd.f32 %v2059_v29, %v2025_v40  ;;  %v1069_v54 = vpop.f32.mrb[23].mxu1 }
 0x20b   : > { %1907 = vst [vmem:[%s2959_s22 + $0x40] sm:$0xff] %v1863_v23   ;;  %v1344_v41 = vadd.f32 %v2091_v39, %v2951_v61  ;;  %v2093_v42 = vadd.f32 %v1241_v32, %v1069_v54  ;;  %v2062_v33 = vpop.f32.mrb[24].mxu0 }
 0x20c   : > { %v1347_v43 = vadd.f32 %v2092_v5, %v2951_v61  ;;  %v1254_v7 = vpop.f32.mrb[25].mxu0  ;;  %v1378_v45 = vmax.f32 %v1346_v31, 0.0 }
 0x20d   : > { %v1345_v22 = vadd.f32 %v2093_v42, %v2951_v61  ;;  %v2063_v44 = vpop.f32.mrb[26].mxu0  ;;  %v1376_v49 = vmax.f32 %v1344_v41, 0.0 }
 0x20e   : > { %v1379_v46 = vmax.f32 %v1347_v43, 0.0  ;;  %v1257_v15 = vpop.f32.mrb[27].mxu0 }
 0x20f   : > { %v1377_v53 = vmax.f32 %v1345_v22, 0.0  ;;  %v2028_v47 = vpop.f32.mrb[24].mxu1 }
 0x210   : > { %v1878_v50 = vpack.c.bf16 %v1379_v46, %v1378_v45  ;;  %v2094_v51 = vadd.f32 %v2062_v33, %v2028_v47  ;;  %v1082_v60 = vpop.f32.mrb[25].mxu1 }
 0x211   : > { %v1873_v52 = vpack.c.bf16 %v1377_v53, %v1376_v49  ;;  %v2095_v3 = vadd.f32 %v1254_v7, %v1082_v60  ;;  %v2029_v58 = vpop.f32.mrb[26].mxu1 }
 0x212   : > { %1910 = vst [vmem:[%s2959_s22 + $0x58] sm:$0xff] %v1878_v50   ;;  %v1350_v62 = vadd.f32 %v2094_v51, %v2951_v61  ;;  %v2096_v1 = vadd.f32 %v2063_v44, %v2029_v58  ;;  %v1085_v55 = vpop.f32.mrb[27].mxu1 }
 0x213   : > { %1909 = vst [vmem:[%s2959_s22 + $0x50] sm:$0xff] %v1873_v52   ;;  %v1348_v57 = vadd.f32 %v2095_v3, %v2951_v61  ;;  %v2097_v4 = vadd.f32 %v1257_v15, %v1085_v55  ;;  %v2066_v56 = vpop.f32.mrb[28].mxu0 }
 0x214   : > { %v1351_v63 = vadd.f32 %v2096_v1, %v2951_v61  ;;  %v1270_v6 = vpop.f32.mrb[29].mxu0  ;;  %v1382_v26 = vmax.f32 %v1350_v62, 0.0 }
 0x215   : > { %v1349_v8 = vadd.f32 %v2097_v4, %v2951_v61  ;;  %v2067_v9 = vpop.f32.mrb[30].mxu0  ;;  %v1380_v10 = vmax.f32 %v1348_v57, 0.0 }
 0x216   : > { %v1383_v59 = vmax.f32 %v1351_v63, 0.0  ;;  %v1273_v17 = vpop.f32.mrb[31].mxu0 }
 0x217   : > { %v1381_v12 = vmax.f32 %v1349_v8, 0.0  ;;  %v2032_v13 = vpop.f32.mrb[28].mxu1 }
 0x218   : > { %v1888_v14 = vpack.c.bf16 %v1383_v59, %v1382_v26  ;;  %v2098_v0 = vadd.f32 %v2066_v56, %v2032_v13  ;;  %v1098_v2 = vpop.f32.mrb[29].mxu1 }
 0x219   : > { %v1883_v16 = vpack.c.bf16 %v1381_v12, %v1380_v10  ;;  %v2099_v18 = vadd.f32 %v1270_v6, %v1098_v2  ;;  %v2033_v20 = vpop.f32.mrb[30].mxu1 }
 0x21a   : > { %1912 = vst [vmem:[%s2959_s22 + $0x68] sm:$0xff] %v1888_v14   ;;  %v1354_v35 = vadd.f32 %v2098_v0, %v2951_v61  ;;  %v2100_v27 = vadd.f32 %v2067_v9, %v2033_v20  ;;  %v1101_v21 = vpop.f32.mrb[31].mxu1 }
 0x21b   : > { %1911 = vst [vmem:[%s2959_s22 + $0x60] sm:$0xff] %v1883_v16   ;;  %v1352_v24 = vadd.f32 %v2099_v18, %v2951_v61  ;;  %v2101_v25 = vadd.f32 %v1273_v17, %v1101_v21 }
 0x21c   : > { %v1355_v28 = vadd.f32 %v2100_v27, %v2951_v61  ;;  %v1386_v11 = vmax.f32 %v1354_v35, 0.0 }
 0x21d   : > { %v1353_v29 = vadd.f32 %v2101_v25, %v2951_v61  ;;  %v1384_v32 = vmax.f32 %v1352_v24, 0.0 }
 0x21e   : > { %v1387_v30 = vmax.f32 %v1355_v28, 0.0 }
 0x21f   : > { %v1385_v48 = vmax.f32 %v1353_v29, 0.0 }
 0x220   : > { %v1898_v36 = vpack.c.bf16 %v1387_v30, %v1386_v11 }
 0x221   : > { %v1893_v34 = vpack.c.bf16 %v1385_v48, %v1384_v32 }
 0x222   : > { %1914 = vst [vmem:[%s2959_s22 + $0x78] sm:$0xff] %v1898_v36  }
 0x223   : > { %1913 = vst [vmem:[%s2959_s22 + $0x70] sm:$0xff] %v1893_v34  }
 0x224   : > { %2345 = shalt.err (!%p2342_p11)
}
 0x225   : > { %s2346_s29 = scalar_lea.hbm %s3012_s19, 2048  ;;  %s2350_s10 = scalar_lea.hbm %s3069_s3, 4096 }
 0x226   : > { %p2347_p0 = scmp.ne.s32.totalorder %s3012_s19, %s2346_s29  ;;  %p2351_p6 = scmp.lt.u32.totalorder %s3012_s19, %s3069_s3 }
 0x227   : > { %p2352_p7 = scmp.lt.u32.totalorder %s2350_s10, %s2346_s29  ;;  %p2354_p8 = scmp.lt.u32.totalorder %s2346_s29, %s3012_s19 }
 0x228   : > { %p2348_p4 = pnand %p2347_p0, %p3088_p12 }
 0x229   : > { %p2353_p2 = por %p2352_p7, %p2351_p6 }
 0x22a   : > { %p2349_p13 = pneg %p2348_p4 }
 0x22b   : > { %p2355_p1 = por %p2354_p8, %p2353_p2 }
 0x22d   : > { %p2356_p10 = pnand %p2355_p1, %p2349_p13 }
 0x22f   : > { %2359 = shalt.err (!%p2356_p10)
}
 0x230   : > { %s2429_s11 = smov 64  }
 0x231   : > { %2148 = dma.vmem_to_hbm [thread:$0]  (%p3088_p12), %s3014_s18, 2048, %s3012_s19, %s1549_s15, %s2429_s11, %s2429_s11, %s2426_s24  }
 0x232 PF: > { %s1578_s26 = sand.u32 1, %s2398_s12   ;;  %p3089_p3 = scmp.ne.s32.totalorder %s3077_s23, 0 }
 0x233   : > { %p3090_p5 = scmp.ge.s32.totalorder %s2418_s17, 2  ;;  %s1579_s9 = scalar_lea.sflag [#allocation4], %s1578_s26 }
 0x235   : > { %p2162_p9 = pnand %p3090_p5, %p3089_p3 }
 0x237   : > { %2393 = dma.done.wait (!%p2162_p9), %s1579_s9, 2048  }
 0x238   : > { %2395 = vsyncadd (!%p2162_p9), %s1579_s9, 4294965248  ;;  %s20_s17 = sadd.s32 1, %s2418_s17   ;;  %s3091_s12 = smov %s2402_s13 }
 0x239   : > { %p17_p11 = scmp.ge.s32.totalorder %s20_s17, 4   ;;  %s3092_s13 = smov %s2406_s14 }
 0x23a   : > { %s3093_s14 = smov %s2596_s6  ;;  %s3094_s15 = smov %s2414_s16 }
 0x23b   : > { %s3095_s16 = smov %s3097_s25  ;;  %19 = sbr.rel (!%p17_p11) target bundleno = 7 (0x7), region = 89 }
 0x242   :  { %1584 = vsyncpa [#allocation3], 1 }
 0x243   :  { %1586 = vsyncpa [#allocation3 + $0x1], 1 }
 0x244   :  { %1587 = vsyncpa [#allocation6], 1 }
 0x245   :  { %1588 = vsyncpa [#allocation4], 1 }
 0x246   :  { %1590 = vsyncpa [#allocation4 + $0x1], 1 }

</bundles_post_ra>
